<compile_context>
chip_gen: v7x
topology: tpu7x:2x2x1
jax: 0.10.0
libtpu: 0.0.40
codegen_flags: <defaults>
</compile_context>

<pallas_src>
import math
from functools import partial

import numpy as np
import jax
import jax.numpy as jnp
from jax import lax
from jax.experimental import pallas as pl
from jax.experimental.pallas import tpu as pltpu


def _default_vmem_limit():
    """Scoped-VMEM limit: cap at ~48 MiB on v7x (64 MiB physical/TC), 64 MiB on v5e/v6e."""
    try:
        kind = jax.devices()[0].device_kind.lower()
    except Exception:
        kind = ""
    if "v7" in kind:
        return 48 * 1024 * 1024
    return 64 * 1024 * 1024


VMEM_LIMIT = _default_vmem_limit()


# ----------------------------------------------------------------------------
# Tile pickers (divisor tiles only, so no partial-block handling is needed)
# ----------------------------------------------------------------------------

def _pick_row_tile(dim, target=256):
    """Largest multiple-of-8 divisor of `dim` that is <= target (else the full dim)."""
    if dim <= target:
        return dim
    for cand in range(target, 7, -8):
        if dim % cand == 0:
            return cand
    return dim


def _pick_lane_tile(dim, target=512):
    """Largest multiple-of-128 divisor of `dim` that is <= target (else the full dim)."""
    # TODO(synk): for huge non-divisible dims (e.g. vocab=50257) this falls back to the full
    # dim; pad the weight to a multiple of 128 or add partial-block masking before using.
    if dim <= target:
        return dim
    for cand in range(target, 127, -128):
        if dim % cand == 0:
            return cand
    return dim


# ----------------------------------------------------------------------------
# Shared math
# ----------------------------------------------------------------------------

def _norm_rows(x, gamma, beta, eps):
    """PyTorch Norm: alpha*(x-mean)/(std+eps)+bias, std is UNBIASED (ddof=1). d_model>=2."""
    d = x.shape[-1]
    mean = jnp.mean(x, axis=-1, keepdims=True)
    diff = x - mean
    var = jnp.sum(diff * diff, axis=-1, keepdims=True) / (d - 1)
    std = jnp.sqrt(var)
    return gamma * diff / (std + eps) + beta


# ----------------------------------------------------------------------------
# Kernel 1: fused attention sublayer  (Norm1 + QKV + causal attention + out-proj + residual)
# ----------------------------------------------------------------------------

def _attn_sublayer_kernel(x_ref, g_ref, bt_ref, wqkv_ref, bqkv_ref, wo_ref, bo_ref,
                          o_ref, qkv_scr, att_scr, *, heads, d_k, eps):
    D = heads * d_k
    scale = 1.0 / math.sqrt(d_k)

    x = x_ref[0].astype(jnp.float32)                                  # (S, D)
    S = x.shape[0]
    xn = _norm_rows(x, g_ref[...], bt_ref[...], eps)

    # Fused Q|K|V projection: one K=d_model, N=3*d_model matmul (lane-dense, stays in VMEM).
    qkv_scr[...] = (jnp.dot(xn, wqkv_ref[...], preferred_element_type=jnp.float32)
                    + bqkv_ref[...])

    # Causal (nopeak) mask generated in-kernel: keep col <= row, else masked_fill(-10000.0).
    rows = lax.broadcasted_iota(jnp.int32, (S, S), 0)
    cols = lax.broadcasted_iota(jnp.int32, (S, S), 1)

    for h in range(heads):  # static unroll; heads is small
        lo = h * d_k
        qh = qkv_scr[:, lo:lo + d_k]
        kh = qkv_scr[:, D + lo:D + lo + d_k]
        vh = qkv_scr[:, 2 * D + lo:2 * D + lo + d_k]
        # scores = q @ k^T * scale  (contract last dims; no explicit transpose of k)
        s = lax.dot_general(qh, kh, (((1,), (1,)), ((), ())),
                            preferred_element_type=jnp.float32) * scale
        s = jnp.where(cols > rows, jnp.float32(-10000.0), s)
        m = jnp.max(s, axis=-1, keepdims=True)
        e = jnp.exp(s - m)
        # approx reciprocal runs on the otherwise-idle EUP (tiny deviation from exact div).
        p = e * pl.reciprocal(jnp.sum(e, axis=-1, keepdims=True), approx=True)
        # Heads written lane-adjacent -> att_scr is already the (S, d_model) "concat" layout.
        att_scr[:, lo:lo + d_k] = jnp.dot(p, vh, preferred_element_type=jnp.float32)

    # Single K=d_model output projection (head-concat folded away), plus residual.
    out = jnp.dot(att_scr[...], wo_ref[...], preferred_element_type=jnp.float32) + bo_ref[...]
    o_ref[0] = (x + out).astype(o_ref.dtype)
    # TODO(synk): for long S (esp. v7x's 64 MiB VMEM) add flash-style KV tiling so the (S,S)
    # score matrix is never materialized; not needed at these shapes.


def attn_sublayer(x3d, gamma, beta, wqkv, bqkv, wo, bo, *, heads, eps=1e-6):
    """x + OutProj(CausalAttention(QKV(Norm1(x)))) in one pallas_call, grid over batch."""
    B, S, D = x3d.shape
    d_k = D // heads
    return pl.pallas_call(
        partial(_attn_sublayer_kernel, heads=heads, d_k=d_k, eps=eps),
        out_shape=jax.ShapeDtypeStruct((B, S, D), x3d.dtype),
        grid=(B,),
        in_specs=[
            pl.BlockSpec((1, S, D), lambda b: (b, 0, 0)),
            pl.BlockSpec((1, D), lambda b: (0, 0)),
            pl.BlockSpec((1, D), lambda b: (0, 0)),
            pl.BlockSpec((D, 3 * D), lambda b: (0, 0)),      # constant block -> DMA'd once
            pl.BlockSpec((1, 3 * D), lambda b: (0, 0)),
            pl.BlockSpec((D, D), lambda b: (0, 0)),          # constant block -> DMA'd once
            pl.BlockSpec((1, D), lambda b: (0, 0)),
        ],
        out_specs=pl.BlockSpec((1, S, D), lambda b: (b, 0, 0)),
        scratch_shapes=[
            pltpu.VMEM((S, 3 * D), jnp.float32),             # fused QKV activations
            pltpu.VMEM((S, D), jnp.float32),                 # lane-dense concat-heads output
        ],
        compiler_params=pltpu.CompilerParams(
            dimension_semantics=("parallel",),
            vmem_limit_bytes=VMEM_LIMIT),
    )(x3d, gamma.reshape(1, D), beta.reshape(1, D), wqkv, bqkv.reshape(1, 3 * D),
      wo, bo.reshape(1, D))


# ----------------------------------------------------------------------------
# Kernel 2: fused feed-forward sublayer  (Norm2 + FF1 + ReLU + FF2 + residual)
# ----------------------------------------------------------------------------

def _ff_sublayer_kernel(x_ref, g_ref, bt_ref, w1_ref, b1_ref, w2_ref, b2_ref, o_ref, *, eps):
    x = x_ref[...].astype(jnp.float32)                                # (tm, D)
    xn = _norm_rows(x, g_ref[...], bt_ref[...], eps)                  # norm once per row tile
    h = jnp.dot(xn, w1_ref[...], preferred_element_type=jnp.float32) + b1_ref[...]
    h = jnp.maximum(h, 0.0)
    y = jnp.dot(h, w2_ref[...], preferred_element_type=jnp.float32) + b2_ref[...]
    o_ref[...] = (x + y).astype(o_ref.dtype)


def ff_sublayer(x2d, gamma, beta, w1, b1, w2, b2, *, eps=1e-6, tm_target=256):
    """x + FF2(ReLU(FF1(Norm2(x)))) in one pallas_call, tiled over rows only.

    Weight block indices are constant across the grid, so w1/w2 are DMA'd from HBM once.
    """
    # TODO(synk): for very large d_ff, tile d_ff with an in-kernel accumulator instead of
    # holding (D,d_ff)+(d_ff,D) weights fully resident; not needed at these sizes.
    M, D = x2d.shape
    d_ff = w1.shape[1]
    tm = _pick_row_tile(M, tm_target)
    return pl.pallas_call(
        partial(_ff_sublayer_kernel, eps=eps),
        out_shape=jax.ShapeDtypeStruct((M, D), x2d.dtype),
        grid=(M // tm,),
        in_specs=[
            pl.BlockSpec((tm, D), lambda i: (i, 0)),
            pl.BlockSpec((1, D), lambda i: (0, 0)),
            pl.BlockSpec((1, D), lambda i: (0, 0)),
            pl.BlockSpec((D, d_ff), lambda i: (0, 0)),       # constant block -> DMA'd once
            pl.BlockSpec((1, d_ff), lambda i: (0, 0)),
            pl.BlockSpec((d_ff, D), lambda i: (0, 0)),       # constant block -> DMA'd once
            pl.BlockSpec((1, D), lambda i: (0, 0)),
        ],
        out_specs=pl.BlockSpec((tm, D), lambda i: (i, 0)),
        compiler_params=pltpu.CompilerParams(
            dimension_semantics=("parallel",),               # row tiles shard across TCs (v7x)
            vmem_limit_bytes=VMEM_LIMIT),
    )(x2d, gamma.reshape(1, D), beta.reshape(1, D), w1, b1.reshape(1, d_ff),
      w2, b2.reshape(1, D))


# ----------------------------------------------------------------------------
# Kernel 3: final Norm fused into the logits projection (weight-resident ordering)
# ----------------------------------------------------------------------------

def _norm_logits_kernel(x_ref, g_ref, bt_ref, w_ref, b_ref, o_ref, xn_ref, *, eps):
    # Norm computed ONCE (first N tile) and cached in VMEM scratch for the whole N sweep.
    @pl.when(pl.program_id(0) == 0)
    def _():
        xn_ref[...] = _norm_rows(x_ref[...].astype(jnp.float32), g_ref[...], bt_ref[...], eps)
    acc = jnp.dot(xn_ref[...], w_ref[...], preferred_element_type=jnp.float32) + b_ref[...]
    o_ref[...] = acc.astype(o_ref.dtype)


def norm_logits(x2d, gamma, beta, w, b, *, eps=1e-6, tn_target=512):
    """logits = Norm(x) @ w + b.

    Grid sweeps only the vocab (N) axis: x stays resident in VMEM (constant block) and each
    weight column tile is streamed from HBM exactly once -> the dominant DMA term (|W|) is 1x.
    The axis is 'arbitrary' because the cached normalized x must survive the sweep.
    """
    M, D = x2d.shape
    N = w.shape[1]
    tn = _pick_lane_tile(N, tn_target)
    return pl.pallas_call(
        partial(_norm_logits_kernel, eps=eps),
        out_shape=jax.ShapeDtypeStruct((M, N), x2d.dtype),
        grid=(N // tn,),
        in_specs=[
            pl.BlockSpec((M, D), lambda j: (0, 0)),          # x resident, DMA'd once
            pl.BlockSpec((1, D), lambda j: (0, 0)),
            pl.BlockSpec((1, D), lambda j: (0, 0)),
            pl.BlockSpec((D, tn), lambda j: (0, j)),         # each W column tile streamed once
            pl.BlockSpec((1, tn), lambda j: (0, j)),
        ],
        out_specs=pl.BlockSpec((M, tn), lambda j: (0, j)),
        scratch_shapes=[pltpu.VMEM((M, D), jnp.float32)],    # cached Norm(x)
        compiler_params=pltpu.CompilerParams(
            dimension_semantics=("arbitrary",),
            vmem_limit_bytes=VMEM_LIMIT),
    )(x2d, gamma.reshape(1, D), beta.reshape(1, D), w, b.reshape(1, N))


# ----------------------------------------------------------------------------
# Model glue (plain JAX: embedding gather, positional encoding, free reshapes)
# ----------------------------------------------------------------------------

def build_positional_encoding(seqlen, d_model):
    # Exactly replicates the (non-standard) loop in PositionalEncoder.__init__.
    pe = np.zeros((seqlen, d_model), dtype=np.float32)
    pos = np.arange(seqlen, dtype=np.float64)[:, None]
    i_even = np.arange(0, d_model, 2, dtype=np.float64)
    pe[:, 0::2] = np.sin(pos / 10000.0 ** (2.0 * i_even / d_model))
    pe[:, 1::2] = np.cos(pos / 10000.0 ** (2.0 * (i_even + 1.0) / d_model))
    return jnp.asarray(pe)


def init_params(key, *, vocab, d_model, n_layers, heads, d_ff, seqlen):
    def nrml(k, shape, scale=0.02):
        return scale * jax.random.normal(k, shape, dtype=jnp.float32)

    keys = iter(jax.random.split(key, 2 + 4 * n_layers))
    params = {
        "heads": heads,
        "embed": nrml(next(keys), (vocab, d_model), 1.0),
        "pe": build_positional_encoding(seqlen, d_model),
        "nf_a": jnp.ones((d_model,), jnp.float32),
        "nf_b": jnp.zeros((d_model,), jnp.float32),
        "w_out": nrml(next(keys), (d_model, vocab)),
        "b_out": jnp.zeros((vocab,), jnp.float32),
        "layers": [],
    }
    for _ in range(n_layers):
        lp = {
            "n1_a": jnp.ones((d_model,), jnp.float32),
            "n1_b": jnp.zeros((d_model,), jnp.float32),
            "n2_a": jnp.ones((d_model,), jnp.float32),
            "n2_b": jnp.zeros((d_model,), jnp.float32),
            # Fused [Wq | Wk | Wv] columns; head h of each section = cols h*d_k:(h+1)*d_k,
            # matching the reference's .view(bs, -1, heads, d_k).
            "wqkv": nrml(next(keys), (d_model, 3 * d_model)),
            "bqkv": jnp.zeros((3 * d_model,), jnp.float32),
            "wo": nrml(next(keys), (d_model, d_model)),
            "bo": jnp.zeros((d_model,), jnp.float32),
            "w1": nrml(next(keys), (d_model, d_ff)),
            "b1": jnp.zeros((d_ff,), jnp.float32),
            "w2": nrml(next(keys), (d_ff, d_model)),
            "b2": jnp.zeros((d_model,), jnp.float32),
        }
        params["layers"].append(lp)
    return params


def transformer_forward(params, trg):
    """Equivalent of Transformer.forward(trg) with trg_mask=None (causal nopeak mask)."""
    B, S = trg.shape
    d_model = params["embed"].shape[1]
    heads = params["heads"]
    M = B * S

    # Embedder + PositionalEncoder (dropout == identity in eval mode).
    # Embedding gather stays in plain JAX (XLA gather); no Pallas win at these sizes.
    x = jnp.take(params["embed"], trg, axis=0)                      # (B, S, d_model)
    x = x * math.sqrt(d_model) + params["pe"][None, :S, :]

    for lp in params["layers"]:
        # Attention sublayer: one pallas_call (norm1 + QKV + attention + out-proj + residual).
        x = attn_sublayer(x, lp["n1_a"], lp["n1_b"], lp["wqkv"], lp["bqkv"],
                          lp["wo"], lp["bo"], heads=heads)
        # Feed-forward sublayer: one pallas_call (norm2 + FF1 + ReLU + FF2 + residual).
        x = ff_sublayer(x.reshape(M, d_model), lp["n2_a"], lp["n2_b"],
                        lp["w1"], lp["b1"], lp["w2"], lp["b2"]).reshape(B, S, d_model)

    # Final Norm fused into the vocab projection (weight streamed once).
    logits = norm_logits(x.reshape(M, d_model), params["nf_a"], params["nf_b"],
                         params["w_out"], params["b_out"])          # (M, vocab)
    return logits.reshape(B, S, -1)


# ----------------------------------------------------------------------------

if __name__ == "__main__":
    # Small config consistent with the module: vocab=64, d_model=32, N=2 layers,
    # heads=4, seqlen=8, batch=2, d_ff=2048 (FeedForward default).
    VOCAB, D_MODEL, N_LAYERS, HEADS, SEQLEN, BATCH, D_FF = 64, 32, 2, 4, 8, 2, 2048

    key = jax.random.PRNGKey(0)
    k_params, k_tok = jax.random.split(key)
    params = init_params(k_params, vocab=VOCAB, d_model=D_MODEL, n_layers=N_LAYERS,
                         heads=HEADS, d_ff=D_FF, seqlen=SEQLEN)
    trg = jax.random.randint(k_tok, (BATCH, SEQLEN), 0, VOCAB, dtype=jnp.int32)

    logits = transformer_forward(params, trg)
    logits = jax.block_until_ready(logits)
    assert logits.shape == (BATCH, SEQLEN, VOCAB)
    assert bool(jnp.all(jnp.isfinite(logits)))
    print("KERNEL_OK")
</pallas_src>

<mosaic_0001>
module attributes {stable_mosaic.version = 11 : i64} {
  func.func @_attn_sublayer_kernel(%arg0: i32, %arg1: memref<1x8x32xf32, #tpu.memory_space<vmem>>, %arg2: memref<1x32xf32, #tpu.memory_space<vmem>>, %arg3: memref<1x32xf32, #tpu.memory_space<vmem>>, %arg4: memref<32x96xf32, #tpu.memory_space<vmem>>, %arg5: memref<1x96xf32, #tpu.memory_space<vmem>>, %arg6: memref<32x32xf32, #tpu.memory_space<vmem>>, %arg7: memref<1x32xf32, #tpu.memory_space<vmem>>, %arg8: memref<1x8x32xf32, #tpu.memory_space<vmem>>, %arg9: memref<8x96xf32, #tpu.memory_space<vmem>>, %arg10: memref<8x32xf32, #tpu.memory_space<vmem>>) attributes {dimension_semantics = [#tpu.dimension_semantics<parallel>], iteration_bounds = array<i64: 2>, scalar_prefetch = 0 : i64, scratch_operands = 2 : i64, tpu.core_type = #tpu.core_type<tc>, window_params = [{transform_indices = @transform_0, window_bounds = array<i64: 1, 8, 32>}, {pipeline_mode = #tpu.pipeline_mode<synchronous>, transform_indices = @transform_1, window_bounds = array<i64: 1, 32>}, {pipeline_mode = #tpu.pipeline_mode<synchronous>, transform_indices = @transform_2, window_bounds = array<i64: 1, 32>}, {pipeline_mode = #tpu.pipeline_mode<synchronous>, transform_indices = @transform_3, window_bounds = array<i64: 32, 96>}, {pipeline_mode = #tpu.pipeline_mode<synchronous>, transform_indices = @transform_4, window_bounds = array<i64: 1, 96>}, {pipeline_mode = #tpu.pipeline_mode<synchronous>, transform_indices = @transform_5, window_bounds = array<i64: 32, 32>}, {pipeline_mode = #tpu.pipeline_mode<synchronous>, transform_indices = @transform_6, window_bounds = array<i64: 1, 32>}, {transform_indices = @transform_7, window_bounds = array<i64: 1, 8, 32>}]} {
    %c0 = arith.constant 0 : index
    %c0_0 = arith.constant 0 : index
    %c0_1 = arith.constant 0 : index
    %0 = vector.load %arg1[%c0, %c0_0, %c0_1] : memref<1x8x32xf32, #tpu.memory_space<vmem>>, vector<1x8x32xf32>
    %1 = vector.shape_cast %0 : vector<1x8x32xf32> to vector<8x32xf32>
    %c0_2 = arith.constant 0 : index
    %c0_3 = arith.constant 0 : index
    %2 = vector.load %arg2[%c0_2, %c0_3] : memref<1x32xf32, #tpu.memory_space<vmem>>, vector<1x32xf32>
    %c0_4 = arith.constant 0 : index
    %c0_5 = arith.constant 0 : index
    %3 = vector.load %arg3[%c0_4, %c0_5] : memref<1x32xf32, #tpu.memory_space<vmem>>, vector<1x32xf32>
    %cst = arith.constant dense<0.000000e+00> : vector<8xf32>
    %4 = vector.multi_reduction <add>, %1, %cst [1] : vector<8x32xf32> to vector<8xf32>
    %5 = vector.shape_cast %4 : vector<8xf32> to vector<8x1xf32>
    %cst_6 = arith.constant 3.200000e+01 : f32
    %6 = vector.broadcast %cst_6 : f32 to vector<8x1xf32>
    %7 = arith.divf %5, %6 : vector<8x1xf32>
    %8 = vector.broadcast %7 : vector<8x1xf32> to vector<8x32xf32>
    %9 = arith.subf %1, %8 : vector<8x32xf32>
    %10 = arith.mulf %9, %9 : vector<8x32xf32>
    %cst_7 = arith.constant dense<0.000000e+00> : vector<8xf32>
    %11 = vector.multi_reduction <add>, %10, %cst_7 [1] : vector<8x32xf32> to vector<8xf32>
    %12 = vector.shape_cast %11 : vector<8xf32> to vector<8x1xf32>
    %cst_8 = arith.constant 3.100000e+01 : f32
    %13 = vector.broadcast %cst_8 : f32 to vector<8x1xf32>
    %14 = arith.divf %12, %13 : vector<8x1xf32>
    %15 = math.sqrt %14 : vector<8x1xf32>
    %16 = vector.broadcast %2 : vector<1x32xf32> to vector<8x32xf32>
    %17 = arith.mulf %16, %9 : vector<8x32xf32>
    %cst_9 = arith.constant 9.99999997E-7 : f32
    %18 = vector.broadcast %cst_9 : f32 to vector<8x1xf32>
    %19 = arith.addf %15, %18 : vector<8x1xf32>
    %20 = vector.broadcast %19 : vector<8x1xf32> to vector<8x32xf32>
    %21 = arith.divf %17, %20 : vector<8x32xf32>
    %22 = vector.broadcast %3 : vector<1x32xf32> to vector<8x32xf32>
    %23 = arith.addf %21, %22 : vector<8x32xf32>
    %c0_10 = arith.constant 0 : index
    %c0_11 = arith.constant 0 : index
    %24 = vector.load %arg4[%c0_10, %c0_11] : memref<32x96xf32, #tpu.memory_space<vmem>>, vector<32x96xf32>
    %cst_12 = arith.constant dense<0.000000e+00> : vector<8x96xf32>
    %25 = tpu.matmul %23, %24, %cst_12 {dimension_numbers = #tpu.dot_dimension_numbers<[1], [0], [0], [1], [0, 0, 1, 1], [], []>} : vector<8x32xf32>, vector<32x96xf32>, vector<8x96xf32> -> vector<8x96xf32>
    %c0_13 = arith.constant 0 : index
    %c0_14 = arith.constant 0 : index
    %26 = vector.load %arg5[%c0_13, %c0_14] : memref<1x96xf32, #tpu.memory_space<vmem>>, vector<1x96xf32>
    %27 = vector.broadcast %26 : vector<1x96xf32> to vector<8x96xf32>
    %28 = arith.addf %25, %27 : vector<8x96xf32>
    %c0_15 = arith.constant 0 : index
    %c0_16 = arith.constant 0 : index
    %29 = vector.load %arg9[%c0_15, %c0_16] : memref<8x96xf32, #tpu.memory_space<vmem>>, vector<8x96xf32>
    tpu.vector_store %arg9[%c0_15, %c0_16], %28 {strides = array<i32>} : memref<8x96xf32, #tpu.memory_space<vmem>>, vector<8x96xf32>,
    %30 = tpu.iota {dimensions = array<i32: 0>} : vector<8x8xi32>
    %31 = tpu.iota {dimensions = array<i32: 1>} : vector<8x8xi32>
    %c0_17 = arith.constant 0 : index
    %c0_18 = arith.constant 0 : index
    %32 = vector.load %arg9[%c0_17, %c0_18] : memref<8x96xf32, #tpu.memory_space<vmem>>, vector<8x8xf32>
    %c0_19 = arith.constant 0 : index
    %c32 = arith.constant 32 : index
    %33 = vector.load %arg9[%c0_19, %c32] : memref<8x96xf32, #tpu.memory_space<vmem>>, vector<8x8xf32>
    %c0_20 = arith.constant 0 : index
    %c64 = arith.constant 64 : index
    %34 = vector.load %arg9[%c0_20, %c64] : memref<8x96xf32, #tpu.memory_space<vmem>>, vector<8x8xf32>
    %cst_21 = arith.constant dense<0.000000e+00> : vector<8x8xf32>
    %35 = tpu.matmul %32, %33, %cst_21 {dimension_numbers = #tpu.dot_dimension_numbers<[1], [1], [0], [0], [0, 0, 1, 0], [], []>} : vector<8x8xf32>, vector<8x8xf32>, vector<8x8xf32> -> vector<8x8xf32>
    %cst_22 = arith.constant 0.353553385 : f32
    %36 = vector.broadcast %cst_22 : f32 to vector<8x8xf32>
    %37 = arith.mulf %35, %36 : vector<8x8xf32>
    %38 = arith.cmpi sgt, %31, %30 : vector<8x8xi32>
    %cst_23 = arith.constant -1.000000e+04 : f32
    %39 = vector.broadcast %cst_23 : f32 to vector<8x8xf32>
    %40 = arith.select %38, %39, %37 : vector<8x8xi1>, vector<8x8xf32>
    %cst_24 = arith.constant dense<0xFF800000> : vector<8xf32>
    %41 = vector.multi_reduction <maximumf>, %40, %cst_24 [1] : vector<8x8xf32> to vector<8xf32>
    %42 = vector.shape_cast %41 : vector<8xf32> to vector<8x1xf32>
    %43 = vector.broadcast %42 : vector<8x1xf32> to vector<8x8xf32>
    %44 = arith.subf %40, %43 : vector<8x8xf32>
    %45 = math.exp %44 : vector<8x8xf32>
    %cst_25 = arith.constant dense<0.000000e+00> : vector<8xf32>
    %46 = vector.multi_reduction <add>, %45, %cst_25 [1] : vector<8x8xf32> to vector<8xf32>
    %47 = vector.shape_cast %46 : vector<8xf32> to vector<8x1xf32>
    %48 = tpu.reciprocal %47 {approx = true} : vector<8x1xf32> -> vector<8x1xf32>
    %49 = vector.broadcast %48 : vector<8x1xf32> to vector<8x8xf32>
    %50 = arith.mulf %45, %49 : vector<8x8xf32>
    %cst_26 = arith.constant dense<0.000000e+00> : vector<8x8xf32>
    %51 = tpu.matmul %50, %34, %cst_26 {dimension_numbers = #tpu.dot_dimension_numbers<[1], [0], [0], [1], [0, 0, 1, 1], [], []>} : vector<8x8xf32>, vector<8x8xf32>, vector<8x8xf32> -> vector<8x8xf32>
    %c0_27 = arith.constant 0 : index
    %c0_28 = arith.constant 0 : index
    %52 = vector.load %arg10[%c0_27, %c0_28] : memref<8x32xf32, #tpu.memory_space<vmem>>, vector<8x8xf32>
    tpu.vector_store %arg10[%c0_27, %c0_28], %51 {strides = array<i32>} : memref<8x32xf32, #tpu.memory_space<vmem>>, vector<8x8xf32>,
    %c0_29 = arith.constant 0 : index
    %c8 = arith.constant 8 : index
    %53 = vector.load %arg9[%c0_29, %c8] : memref<8x96xf32, #tpu.memory_space<vmem>>, vector<8x8xf32>
    %c0_30 = arith.constant 0 : index
    %c40 = arith.constant 40 : index
    %54 = vector.load %arg9[%c0_30, %c40] : memref<8x96xf32, #tpu.memory_space<vmem>>, vector<8x8xf32>
    %c0_31 = arith.constant 0 : index
    %c72 = arith.constant 72 : index
    %55 = vector.load %arg9[%c0_31, %c72] : memref<8x96xf32, #tpu.memory_space<vmem>>, vector<8x8xf32>
    %cst_32 = arith.constant dense<0.000000e+00> : vector<8x8xf32>
    %56 = tpu.matmul %53, %54, %cst_32 {dimension_numbers = #tpu.dot_dimension_numbers<[1], [1], [0], [0], [0, 0, 1, 0], [], []>} : vector<8x8xf32>, vector<8x8xf32>, vector<8x8xf32> -> vector<8x8xf32>
    %cst_33 = arith.constant 0.353553385 : f32
    %57 = vector.broadcast %cst_33 : f32 to vector<8x8xf32>
    %58 = arith.mulf %56, %57 : vector<8x8xf32>
    %59 = arith.cmpi sgt, %31, %30 : vector<8x8xi32>
    %cst_34 = arith.constant -1.000000e+04 : f32
    %60 = vector.broadcast %cst_34 : f32 to vector<8x8xf32>
    %61 = arith.select %59, %60, %58 : vector<8x8xi1>, vector<8x8xf32>
    %cst_35 = arith.constant dense<0xFF800000> : vector<8xf32>
    %62 = vector.multi_reduction <maximumf>, %61, %cst_35 [1] : vector<8x8xf32> to vector<8xf32>
    %63 = vector.shape_cast %62 : vector<8xf32> to vector<8x1xf32>
    %64 = vector.broadcast %63 : vector<8x1xf32> to vector<8x8xf32>
    %65 = arith.subf %61, %64 : vector<8x8xf32>
    %66 = math.exp %65 : vector<8x8xf32>
    %cst_36 = arith.constant dense<0.000000e+00> : vector<8xf32>
    %67 = vector.multi_reduction <add>, %66, %cst_36 [1] : vector<8x8xf32> to vector<8xf32>
    %68 = vector.shape_cast %67 : vector<8xf32> to vector<8x1xf32>
    %69 = tpu.reciprocal %68 {approx = true} : vector<8x1xf32> -> vector<8x1xf32>
    %70 = vector.broadcast %69 : vector<8x1xf32> to vector<8x8xf32>
    %71 = arith.mulf %66, %70 : vector<8x8xf32>
    %cst_37 = arith.constant dense<0.000000e+00> : vector<8x8xf32>
    %72 = tpu.matmul %71, %55, %cst_37 {dimension_numbers = #tpu.dot_dimension_numbers<[1], [0], [0], [1], [0, 0, 1, 1], [], []>} : vector<8x8xf32>, vector<8x8xf32>, vector<8x8xf32> -> vector<8x8xf32>
    %c0_38 = arith.constant 0 : index
    %c8_39 = arith.constant 8 : index
    %73 = vector.load %arg10[%c0_38, %c8_39] : memref<8x32xf32, #tpu.memory_space<vmem>>, vector<8x8xf32>
    tpu.vector_store %arg10[%c0_38, %c8_39], %72 {strides = array<i32>} : memref<8x32xf32, #tpu.memory_space<vmem>>, vector<8x8xf32>,
    %c0_40 = arith.constant 0 : index
    %c16 = arith.constant 16 : index
    %74 = vector.load %arg9[%c0_40, %c16] : memref<8x96xf32, #tpu.memory_space<vmem>>, vector<8x8xf32>
    %c0_41 = arith.constant 0 : index
    %c48 = arith.constant 48 : index
    %75 = vector.load %arg9[%c0_41, %c48] : memref<8x96xf32, #tpu.memory_space<vmem>>, vector<8x8xf32>
    %c0_42 = arith.constant 0 : index
    %c80 = arith.constant 80 : index
    %76 = vector.load %arg9[%c0_42, %c80] : memref<8x96xf32, #tpu.memory_space<vmem>>, vector<8x8xf32>
    %cst_43 = arith.constant dense<0.000000e+00> : vector<8x8xf32>
    %77 = tpu.matmul %74, %75, %cst_43 {dimension_numbers = #tpu.dot_dimension_numbers<[1], [1], [0], [0], [0, 0, 1, 0], [], []>} : vector<8x8xf32>, vector<8x8xf32>, vector<8x8xf32> -> vector<8x8xf32>
    %cst_44 = arith.constant 0.353553385 : f32
    %78 = vector.broadcast %cst_44 : f32 to vector<8x8xf32>
    %79 = arith.mulf %77, %78 : vector<8x8xf32>
    %80 = arith.cmpi sgt, %31, %30 : vector<8x8xi32>
    %cst_45 = arith.constant -1.000000e+04 : f32
    %81 = vector.broadcast %cst_45 : f32 to vector<8x8xf32>
    %82 = arith.select %80, %81, %79 : vector<8x8xi1>, vector<8x8xf32>
    %cst_46 = arith.constant dense<0xFF800000> : vector<8xf32>
    %83 = vector.multi_reduction <maximumf>, %82, %cst_46 [1] : vector<8x8xf32> to vector<8xf32>
    %84 = vector.shape_cast %83 : vector<8xf32> to vector<8x1xf32>
    %85 = vector.broadcast %84 : vector<8x1xf32> to vector<8x8xf32>
    %86 = arith.subf %82, %85 : vector<8x8xf32>
    %87 = math.exp %86 : vector<8x8xf32>
    %cst_47 = arith.constant dense<0.000000e+00> : vector<8xf32>
    %88 = vector.multi_reduction <add>, %87, %cst_47 [1] : vector<8x8xf32> to vector<8xf32>
    %89 = vector.shape_cast %88 : vector<8xf32> to vector<8x1xf32>
    %90 = tpu.reciprocal %89 {approx = true} : vector<8x1xf32> -> vector<8x1xf32>
    %91 = vector.broadcast %90 : vector<8x1xf32> to vector<8x8xf32>
    %92 = arith.mulf %87, %91 : vector<8x8xf32>
    %cst_48 = arith.constant dense<0.000000e+00> : vector<8x8xf32>
    %93 = tpu.matmul %92, %76, %cst_48 {dimension_numbers = #tpu.dot_dimension_numbers<[1], [0], [0], [1], [0, 0, 1, 1], [], []>} : vector<8x8xf32>, vector<8x8xf32>, vector<8x8xf32> -> vector<8x8xf32>
    %c0_49 = arith.constant 0 : index
    %c16_50 = arith.constant 16 : index
    %94 = vector.load %arg10[%c0_49, %c16_50] : memref<8x32xf32, #tpu.memory_space<vmem>>, vector<8x8xf32>
    tpu.vector_store %arg10[%c0_49, %c16_50], %93 {strides = array<i32>} : memref<8x32xf32, #tpu.memory_space<vmem>>, vector<8x8xf32>,
    %c0_51 = arith.constant 0 : index
    %c24 = arith.constant 24 : index
    %95 = vector.load %arg9[%c0_51, %c24] : memref<8x96xf32, #tpu.memory_space<vmem>>, vector<8x8xf32>
    %c0_52 = arith.constant 0 : index
    %c56 = arith.constant 56 : index
    %96 = vector.load %arg9[%c0_52, %c56] : memref<8x96xf32, #tpu.memory_space<vmem>>, vector<8x8xf32>
    %c0_53 = arith.constant 0 : index
    %c88 = arith.constant 88 : index
    %97 = vector.load %arg9[%c0_53, %c88] : memref<8x96xf32, #tpu.memory_space<vmem>>, vector<8x8xf32>
    %cst_54 = arith.constant dense<0.000000e+00> : vector<8x8xf32>
    %98 = tpu.matmul %95, %96, %cst_54 {dimension_numbers = #tpu.dot_dimension_numbers<[1], [1], [0], [0], [0, 0, 1, 0], [], []>} : vector<8x8xf32>, vector<8x8xf32>, vector<8x8xf32> -> vector<8x8xf32>
    %cst_55 = arith.constant 0.353553385 : f32
    %99 = vector.broadcast %cst_55 : f32 to vector<8x8xf32>
    %100 = arith.mulf %98, %99 : vector<8x8xf32>
    %101 = arith.cmpi sgt, %31, %30 : vector<8x8xi32>
    %cst_56 = arith.constant -1.000000e+04 : f32
    %102 = vector.broadcast %cst_56 : f32 to vector<8x8xf32>
    %103 = arith.select %101, %102, %100 : vector<8x8xi1>, vector<8x8xf32>
    %cst_57 = arith.constant dense<0xFF800000> : vector<8xf32>
    %104 = vector.multi_reduction <maximumf>, %103, %cst_57 [1] : vector<8x8xf32> to vector<8xf32>
    %105 = vector.shape_cast %104 : vector<8xf32> to vector<8x1xf32>
    %106 = vector.broadcast %105 : vector<8x1xf32> to vector<8x8xf32>
    %107 = arith.subf %103, %106 : vector<8x8xf32>
    %108 = math.exp %107 : vector<8x8xf32>
    %cst_58 = arith.constant dense<0.000000e+00> : vector<8xf32>
    %109 = vector.multi_reduction <add>, %108, %cst_58 [1] : vector<8x8xf32> to vector<8xf32>
    %110 = vector.shape_cast %109 : vector<8xf32> to vector<8x1xf32>
    %111 = tpu.reciprocal %110 {approx = true} : vector<8x1xf32> -> vector<8x1xf32>
    %112 = vector.broadcast %111 : vector<8x1xf32> to vector<8x8xf32>
    %113 = arith.mulf %108, %112 : vector<8x8xf32>
    %cst_59 = arith.constant dense<0.000000e+00> : vector<8x8xf32>
    %114 = tpu.matmul %113, %97, %cst_59 {dimension_numbers = #tpu.dot_dimension_numbers<[1], [0], [0], [1], [0, 0, 1, 1], [], []>} : vector<8x8xf32>, vector<8x8xf32>, vector<8x8xf32> -> vector<8x8xf32>
    %c0_60 = arith.constant 0 : index
    %c24_61 = arith.constant 24 : index
    %115 = vector.load %arg10[%c0_60, %c24_61] : memref<8x32xf32, #tpu.memory_space<vmem>>, vector<8x8xf32>
    tpu.vector_store %arg10[%c0_60, %c24_61], %114 {strides = array<i32>} : memref<8x32xf32, #tpu.memory_space<vmem>>, vector<8x8xf32>,
    %c0_62 = arith.constant 0 : index
    %c0_63 = arith.constant 0 : index
    %116 = vector.load %arg10[%c0_62, %c0_63] : memref<8x32xf32, #tpu.memory_space<vmem>>, vector<8x32xf32>
    %c0_64 = arith.constant 0 : index
    %c0_65 = arith.constant 0 : index
    %117 = vector.load %arg6[%c0_64, %c0_65] : memref<32x32xf32, #tpu.memory_space<vmem>>, vector<32x32xf32>
    %cst_66 = arith.constant dense<0.000000e+00> : vector<8x32xf32>
    %118 = tpu.matmul %116, %117, %cst_66 {dimension_numbers = #tpu.dot_dimension_numbers<[1], [0], [0], [1], [0, 0, 1, 1], [], []>} : vector<8x32xf32>, vector<32x32xf32>, vector<8x32xf32> -> vector<8x32xf32>
    %c0_67 = arith.constant 0 : index
    %c0_68 = arith.constant 0 : index
    %119 = vector.load %arg7[%c0_67, %c0_68] : memref<1x32xf32, #tpu.memory_space<vmem>>, vector<1x32xf32>
    %120 = vector.broadcast %119 : vector<1x32xf32> to vector<8x32xf32>
    %121 = arith.addf %118, %120 : vector<8x32xf32>
    %122 = arith.addf %1, %121 : vector<8x32xf32>
    %c0_69 = arith.constant 0 : index
    %c0_70 = arith.constant 0 : index
    %c0_71 = arith.constant 0 : index
    %123 = vector.load %arg8[%c0_69, %c0_70, %c0_71] : memref<1x8x32xf32, #tpu.memory_space<vmem>>, vector<1x8x32xf32>
    %124 = vector.shape_cast %123 : vector<1x8x32xf32> to vector<8x32xf32>
    %125 = vector.shape_cast %122 : vector<8x32xf32> to vector<1x8x32xf32>
    tpu.vector_store %arg8[%c0_69, %c0_70, %c0_71], %125 {strides = array<i32>} : memref<1x8x32xf32, #tpu.memory_space<vmem>>, vector<1x8x32xf32>,
    return
  }
  func.func @transform_0(%arg0: i32) -> (i32, i32, i32) {
    %c0_i32 = arith.constant 0 : i32
    %c0_i32_0 = arith.constant 0 : i32
    %c0_i32_1 = arith.constant 0 : i32
    return %arg0, %c0_i32, %c0_i32_0 : i32, i32, i32
  }
  func.func @transform_1(%arg0: i32) -> (i32, i32) {
    %c0_i32 = arith.constant 0 : i32
    %c0_i32_0 = arith.constant 0 : i32
    %c0_i32_1 = arith.constant 0 : i32
    return %c0_i32, %c0_i32_0 : i32, i32
  }
  func.func @transform_2(%arg0: i32) -> (i32, i32) {
    %c0_i32 = arith.constant 0 : i32
    %c0_i32_0 = arith.constant 0 : i32
    %c0_i32_1 = arith.constant 0 : i32
    return %c0_i32, %c0_i32_0 : i32, i32
  }
  func.func @transform_3(%arg0: i32) -> (i32, i32) {
    %c0_i32 = arith.constant 0 : i32
    %c0_i32_0 = arith.constant 0 : i32
    %c0_i32_1 = arith.constant 0 : i32
    return %c0_i32, %c0_i32_0 : i32, i32
  }
  func.func @transform_4(%arg0: i32) -> (i32, i32) {
    %c0_i32 = arith.constant 0 : i32
    %c0_i32_0 = arith.constant 0 : i32
    %c0_i32_1 = arith.constant 0 : i32
    return %c0_i32, %c0_i32_0 : i32, i32
  }
  func.func @transform_5(%arg0: i32) -> (i32, i32) {
    %c0_i32 = arith.constant 0 : i32
    %c0_i32_0 = arith.constant 0 : i32
    %c0_i32_1 = arith.constant 0 : i32
    return %c0_i32, %c0_i32_0 : i32, i32
  }
  func.func @transform_6(%arg0: i32) -> (i32, i32) {
    %c0_i32 = arith.constant 0 : i32
    %c0_i32_0 = arith.constant 0 : i32
    %c0_i32_1 = arith.constant 0 : i32
    return %c0_i32, %c0_i32_0 : i32, i32
  }
  func.func @transform_7(%arg0: i32) -> (i32, i32, i32) {
    %c0_i32 = arith.constant 0 : i32
    %c0_i32_0 = arith.constant 0 : i32
    %c0_i32_1 = arith.constant 0 : i32
    return %arg0, %c0_i32, %c0_i32_0 : i32, i32, i32
  }
}

</mosaic_0001>

<bundles_post_ra>
// kernel: tpu_custom_call.1
= control target key start
LH: loop header
LB: loop body
LE: loop exit
PB: predicated region body
PF: predicated region fallthrough
CT: control target
= control target key end

     0   :  { %12 = vsyncpa [#allocation5], 0  ;;  %s2479_s0 = inlined_call_operand.hbm [shape: f32[2,8,32], index: 0, kind: input, shape index: {}]   ;;  %s2480_s1 = inlined_call_operand.hbm [shape: f32[1,32], index: 1, kind: input, shape index: {}]   ;;  %s2481_s2 = inlined_call_operand.hbm [shape: f32[1,32], index: 2, kind: input, shape index: {}]   ;;  %s2482_s3 = inlined_call_operand.hbm [shape: f32[32,96], index: 3, kind: input, shape index: {}]   ;;  %s2483_s4 = inlined_call_operand.hbm [shape: f32[1,96], index: 4, kind: input, shape index: {}]   ;;  %s2484_s5 = inlined_call_operand.hbm [shape: f32[32,32], index: 5, kind: input, shape index: {}]   ;;  %s2485_s6 = inlined_call_operand.hbm [shape: f32[1,32], index: 6, kind: input, shape index: {}]   ;;  %s2486_s7 = inlined_call_operand.hbm [shape: f32[2,8,32], index: 7, kind: output, shape index: {}]  }
   0x1   :  { %14 = vsyncpa [#allocation5 + $0x1], 0 }
   0x2   :  { %15 = vsyncpa [#allocation8], 0 }
   0x3   :  { %16 = vsyncpa [#allocation11], 0 }
   0x4   :  { %17 = vsyncpa [#allocation14], 0 }
   0x5   :  { %18 = vsyncpa [#allocation6], 0 }
   0x6   :  { %20 = vsyncpa [#allocation6 + $0x1], 0  ;;  %s2059_s24 = smov 0   ;;  %s2061_s25 = smov 0  }
   0x7   :  { %s2063_s26 = smov 0   ;;  %s2065_s27 = smov 0  }
   0x8 LB: > { %s1992_s28 = smov [#allocation7]   ;;  %s2080_s30 = sadd.s32 4294967295, %s1990_s27   ;;  %s1990_s27 = sphi %s2065_s27, %s2512_s27   ;;  %s1986_s26 = sphi %s2063_s26, %s2511_s26   ;;  %s1982_s25 = sphi %s2061_s25, %s2510_s25   ;;  %s1978_s24 = sphi %s2059_s24, %s2509_s24  }
   0x9   : > { %s222_s29 = sshll.u32 %s1992_s28, 4  ;;  %p1427_p0 = scmp.ge.s32.totalorder %s1990_s27, 1  ;;  %s2085_s29 = int_to_ptr.vmem [resolvable:$true] %s222_s29 }
   0xa   : > { %p2487_p1 = scmp.eq.s32.totalorder %s2080_s30, 0  ;;  %p209_p2 = scmp.lt.s32.totalorder %s1990_s27, 3 }
   0xb   : > { %s1993_s9 = smov [#allocation10]   ;;  %s1994_s12 = smov [#allocation13]  }
   0xc   : > { %p2087_p3 = pnand %p1427_p0, %p209_p2  ;;  %s243_s10 = sshll.u32 %s1993_s9, 4  ;;  %s2094_s10 = int_to_ptr.vmem [resolvable:$true] %s243_s10 }
   0xd   : > { %s267_s13 = sshll.u32 %s1994_s12, 4  ;;  %s1714_s16 = scalar_lea.hbm %s2480_s1, 16  ;;  %s2102_s13 = int_to_ptr.vmem [resolvable:$true] %s267_s13 }
   0xe   : > { %s2490_s8 = scalar_select %p2087_p3, 1, 0 }
   0xf   : > { %p1596_p5 = pneg %p2087_p3  ;;  %p1715_p7 = scmp.ne.s32.totalorder %s2480_s1, %s1714_s16 }
  0x10   : > { %p1721_p11 = scmp.lt.u32.totalorder %s1714_s16, %s2480_s1 }
  0x11   : > { %p2098_p6 = pnand %p1596_p5, %p2487_p1 }
  0x13   : > { %p2112_p8 = pneg %p2098_p6 }
  0x15   : > { %p1717_p9 = pnand %p2112_p8, %p1715_p7 }
  0x17   : > { %p1718_p10 = pneg %p1717_p9 }
  0x19   : > { %p1723_p12 = pnand %p1721_p11, %p1718_p10 }
  0x1b   : > { %1726 = shalt.err (!%p1723_p12)
}
  0x1c   : > { %s1727_s22 = scalar_lea.vmem %s2085_s29, 16  ;;  %s1734_s23 = scalar_lea.vmem %s2085_s29, 32 }
  0x1d   : > { %p1728_p13 = scmp.ne.s32.totalorder %s2085_s29, %s1727_s22  ;;  %p1735_p5 = scmp.lt.s32.totalorder %s2085_s29, %s2085_s29 }
  0x1e   : > { %p1736_p7 = scmp.lt.s32.totalorder %s1734_s23, %s1727_s22 }
  0x1f   : > { %p1730_p0 = pnand %p1728_p13, %p2112_p8 }
  0x20   : > { %p1737_p9 = por %p1736_p7, %p1735_p5 }
  0x21   : > { %p1731_p2 = pneg %p1730_p0 }
  0x23   : > { %p1738_p4 = pnand %p1737_p9, %p1731_p2 }
  0x25   : > { %1741 = shalt.err (!%p1738_p4)
}
  0x26   : > { %1599 = dma.hbm_to_vmem [thread:$0]  (!%p2098_p6), %s2480_s1, 16, %s2085_s29, [#allocation8]  }
  0x27   : > { %s1742_s15 = scalar_lea.hbm %s2482_s3, 512 }
  0x28   : > { %p1743_p10 = scmp.ne.s32.totalorder %s2482_s3, %s1742_s15  ;;  %p1749_p4 = scmp.lt.u32.totalorder %s1742_s15, %s2482_s3 }
  0x2a   : > { %p1745_p11 = pnand %p1743_p10, %p2112_p8 }
  0x2c   : > { %p1746_p12 = pneg %p1745_p11 }
  0x2e   : > { %p1751_p13 = pnand %p1749_p4, %p1746_p12 }
  0x30   : > { %1754 = shalt.err (!%p1751_p13)
}
  0x31   : > { %s1755_s29 = scalar_lea.vmem %s2094_s10, 512  ;;  %p1763_p7 = scmp.lt.s32.totalorder %s2094_s10, %s2094_s10 }
  0x32   : > { %p1756_p0 = scmp.ne.s32.totalorder %s2094_s10, %s1755_s29  ;;  %p1764_p9 = scmp.lt.s32.totalorder %s1755_s29, %s1755_s29 }
  0x34   : > { %p1758_p2 = pnand %p1756_p0, %p2112_p8  ;;  %p1765_p10 = por %p1764_p9, %p1763_p7 }
  0x36   : > { %p1759_p5 = pneg %p1758_p2 }
  0x38   : > { %p1766_p11 = pnand %p1765_p10, %p1759_p5 }
  0x3a   : > { %1769 = shalt.err (!%p1766_p11)
}
  0x3b   : > { %s1995_s21 = smov 128   ;;  %s1996_s22 = smov 8  }
  0x3c   : > { %1605 = dma.hbm_to_vmem [thread:$0]  (!%p2098_p6), %s2482_s3, 512, %s2094_s10, [#allocation11], %s1995_s21, %s1995_s21, %s1996_s22  }
  0x3d   : > { %s1770_s14 = scalar_lea.hbm %s2484_s5, 512 }
  0x3e   : > { %p1771_p12 = scmp.ne.s32.totalorder %s2484_s5, %s1770_s14  ;;  %p1777_p0 = scmp.lt.u32.totalorder %s1770_s14, %s2484_s5 }
  0x40   : > { %p1773_p4 = pnand %p1771_p12, %p2112_p8 }
  0x42   : > { %p1774_p13 = pneg %p1773_p4 }
  0x44   : > { %p1779_p2 = pnand %p1777_p0, %p1774_p13 }
  0x46   : > { %1782 = shalt.err (!%p1779_p2)
}
  0x47   : > { %s1783_s10 = scalar_lea.vmem %s2102_s13, 512  ;;  %p1791_p10 = scmp.lt.s32.totalorder %s2102_s13, %s2102_s13 }
  0x48   : > { %p1784_p5 = scmp.ne.s32.totalorder %s2102_s13, %s1783_s10  ;;  %p1792_p11 = scmp.lt.s32.totalorder %s1783_s10, %s1783_s10 }
  0x4a   : > { %p1786_p7 = pnand %p1784_p5, %p2112_p8  ;;  %p1793_p12 = por %p1792_p11, %p1791_p10 }
  0x4c   : > { %p1787_p9 = pneg %p1786_p7 }
  0x4e   : > { %p1794_p4 = pnand %p1793_p12, %p1787_p9 }
  0x50   : > { %1797 = shalt.err (!%p1794_p4)
}
  0x51   : > { %1611 = dma.hbm_to_vmem [thread:$0]  (!%p2098_p6), %s2484_s5, 512, %s2102_s13, [#allocation14], %s1995_s21, %s1995_s21, %s1996_s22  }
  0x52   : > { %s1997_s23 = smov [#allocation9]   ;;  %s1998_s9 = smov [#allocation12]  }
  0x53   : > { %s233_s28 = sshll.u32 %s1997_s23, 4  ;;  %s257_s12 = sshll.u32 %s1998_s9, 4  ;;  %s234_s28 = int_to_ptr.vmem [resolvable:$true] %s233_s28  ;;  %s258_s12 = int_to_ptr.vmem [resolvable:$true] %s257_s12 }
  0x54   : > { %s1798_s16 = scalar_lea.hbm %s2481_s2, 16 }
  0x55   : > { %p1799_p13 = scmp.ne.s32.totalorder %s2481_s2, %s1798_s16  ;;  %p1805_p5 = scmp.lt.u32.totalorder %s1798_s16, %s2481_s2 }
  0x57   : > { %p1801_p0 = pnand %p1799_p13, %p2112_p8 }
  0x59   : > { %p1802_p2 = pneg %p1801_p0 }
  0x5b   : > { %p1807_p7 = pnand %p1805_p5, %p1802_p2 }
  0x5d   : > { %1810 = shalt.err (!%p1807_p7)
}
  0x5e   : > { %s1811_s13 = scalar_lea.vmem %s234_s28, 16  ;;  %s1818_s21 = scalar_lea.vmem %s234_s28, 32 }
  0x5f   : > { %p1812_p9 = scmp.ne.s32.totalorder %s234_s28, %s1811_s13  ;;  %p1819_p12 = scmp.lt.s32.totalorder %s234_s28, %s234_s28 }
  0x60   : > { %p1820_p4 = scmp.lt.s32.totalorder %s1818_s21, %s1811_s13 }
  0x61   : > { %p1814_p10 = pnand %p1812_p9, %p2112_p8 }
  0x62   : > { %p1821_p1 = por %p1820_p4, %p1819_p12 }
  0x63   : > { %p1815_p11 = pneg %p1814_p10 }
  0x65   : > { %p1822_p3 = pnand %p1821_p1, %p1815_p11 }
  0x67   : > { %1825 = shalt.err (!%p1822_p3)
}
  0x68   : > { %1602 = dma.hbm_to_vmem [thread:$0]  (!%p2098_p6), %s2481_s2, 16, %s234_s28, [#allocation8]  }
  0x69   : > { %s1826_s14 = scalar_lea.hbm %s2483_s4, 16 }
  0x6a   : > { %p1827_p13 = scmp.ne.s32.totalorder %s2483_s4, %s1826_s14  ;;  %p1833_p3 = scmp.lt.u32.totalorder %s1826_s14, %s2483_s4 }
  0x6c   : > { %p1829_p0 = pnand %p1827_p13, %p2112_p8 }
  0x6e   : > { %p1830_p1 = pneg %p1829_p0 }
  0x70   : > { %p1835_p2 = pnand %p1833_p3, %p1830_p1 }
  0x72   : > { %1838 = shalt.err (!%p1835_p2)
}
  0x73   : > { %s1839_s10 = scalar_lea.vmem %s258_s12, 16  ;;  %s1846_s28 = scalar_lea.vmem %s258_s12, 32 }
  0x74   : > { %p1840_p5 = scmp.ne.s32.totalorder %s258_s12, %s1839_s10  ;;  %p1847_p10 = scmp.lt.s32.totalorder %s258_s12, %s258_s12 }
  0x75   : > { %p1848_p11 = scmp.lt.s32.totalorder %s1846_s28, %s1839_s10 }
  0x76   : > { %p1842_p7 = pnand %p1840_p5, %p2112_p8 }
  0x77   : > { %p1849_p12 = por %p1848_p11, %p1847_p10 }
  0x78   : > { %p1843_p9 = pneg %p1842_p7 }
  0x7a   : > { %p1850_p4 = pnand %p1849_p12, %p1843_p9 }
  0x7c   : > { %1853 = shalt.err (!%p1850_p4)
}
  0x7d   : > { %1608 = dma.hbm_to_vmem [thread:$0]  (!%p2098_p6), %s2483_s4, 16, %s258_s12, [#allocation11]  }
  0x7e   : > { %s1999_s21 = smov [#allocation15]   ;;  %s1854_s9 = scalar_lea.hbm %s2485_s6, 16 }
  0x7f   : > { %s281_s22 = sshll.u32 %s1999_s21, 4  ;;  %p1855_p13 = scmp.ne.s32.totalorder %s2485_s6, %s1854_s9  ;;  %s282_s22 = int_to_ptr.vmem [resolvable:$true] %s281_s22 }
  0x80   : > { %p1861_p3 = scmp.lt.u32.totalorder %s1854_s9, %s2485_s6 }
  0x81   : > { %p1857_p0 = pnand %p1855_p13, %p2112_p8 }
  0x83   : > { %p1858_p1 = pneg %p1857_p0 }
  0x85   : > { %p1863_p2 = pnand %p1861_p3, %p1858_p1 }
  0x87   : > { %1866 = shalt.err (!%p1863_p2)
}
  0x88   : > { %s1867_s12 = scalar_lea.vmem %s282_s22, 16  ;;  %s1874_s18 = scalar_lea.vmem %s282_s22, 32 }
  0x89   : > { %p1868_p5 = scmp.ne.s32.totalorder %s282_s22, %s1867_s12  ;;  %p1875_p10 = scmp.lt.s32.totalorder %s282_s22, %s282_s22 }
  0x8a   : > { %p1876_p11 = scmp.lt.s32.totalorder %s1874_s18, %s1867_s12 }
  0x8b   : > { %p1870_p7 = pnand %p1868_p5, %p2112_p8 }
  0x8c   : > { %p1877_p12 = por %p1876_p11, %p1875_p10 }
  0x8d   : > { %p1871_p9 = pneg %p1870_p7 }
  0x8f   : > { %p1878_p4 = pnand %p1877_p12, %p1871_p9 }
  0x91   : > { %1881 = shalt.err (!%p1878_p4)
}
  0x92   : > { %1614 = dma.hbm_to_vmem [thread:$0]  (!%p2098_p6), %s2485_s6, 16, %s282_s22, [#allocation14]  }
  0x93   : > { %s1426_s19 = sadd.s32 4294967294, %s1990_s27   ;;  %s2236_s11 = sadd.s32 1, %s1990_s27  }
  0x94   : > { %s30_s20 = ssub.s32 %s1990_s27, %s2236_s11  ;;  %s33_s13 = sadd.s32 1, %s1986_s26 }
  0x95   : > { %p31_p8 = scmp.eq.s32.totalorder %s30_s20, 0  ;;  %p40_p13 = scmp.ne.s32.totalorder %s1986_s26, %s1982_s25 }
  0x96   : > { %p41_p0 = scmp.eq.s32.totalorder %s1990_s27, 0  ;;  %p46_p1 = scmp.ne.s32.totalorder %s1982_s25, %s1978_s24 }
  0x97   : > { %s2247_s21 = scalar_select %p31_p8, %s1986_s26, %s33_s13  }
  0x98   : > { %p2249_p3 = por %p41_p0, %p40_p13  ;;  %p2494_p2 = scmp.eq.s32.totalorder %s2080_s30, 0 }
  0x99   : > { %p196_p5 = scmp.eq.s32.totalorder %s2080_s30, 1  ;;  %p202_p7 = scmp.eq.s32.totalorder %s1426_s19, 1 }
  0x9a   : > { %p2255_p6 = por %p2494_p2, %p46_p1  ;;  %p1629_p9 = scmp.lt.s32.totalorder %s1990_s27, 2 }
  0x9b   : > { %s292_s23 = sand.u32 1, %s1986_s26   ;;  %p2262_p10 = por %p196_p5, %p40_p13 }
  0x9c   : > { %p2266_p11 = por %p202_p7, %p46_p1  ;;  %s1435_s15 = sshll.u32 %s292_s23, 3 }
  0x9d   : > { %s2496_s9 = scalar_select %p2262_p10, 1, 0 }
  0x9e   : > { %s2497_s14 = scalar_select %p2266_p11, 1, 0 }
  0x9f   : > { %s1436_s16 = sshll.u32 %s1990_s27, 7  ;;  %s296_s10 = scalar_lea.vmem [#allocation4], %s1435_s15 }
  0xa0   : > { %s2274_s18 = scalar_lea.hbm %s2479_s0, %s1436_s16  ;;  %s303_s28 = sshll.u32 %s296_s10, 4  ;;  %s2276_s28 = int_to_ptr.vmem [resolvable:$true] %s303_s28 }
  0xa1   : > { %p2280_p12 = pnand %p1629_p9, %p2249_p3  ;;  %s293_s20 = scalar_lea.sflag [#allocation5], %s292_s23 }
  0xa2   : > { %s1882_s13 = scalar_lea.hbm %s2274_s18, 128  ;;  %s1887_s17 = scalar_lea.hbm %s2479_s0, 256 }
  0xa3   : > { %p1883_p4 = scmp.ne.s32.totalorder %s2274_s18, %s1882_s13  ;;  %p1884_p8 = pneg %p2280_p12 }
  0xa4   : > { %p1888_p1 = scmp.lt.u32.totalorder %s2274_s18, %s2479_s0  ;;  %p1889_p3 = scmp.lt.u32.totalorder %s1887_s17, %s1882_s13 }
  0xa5   : > { %p1885_p13 = pnand %p1884_p8, %p1883_p4  ;;  %p1891_p5 = scmp.lt.u32.totalorder %s1882_s13, %s2274_s18 }
  0xa6   : > { %p1890_p2 = por %p1889_p3, %p1888_p1 }
  0xa7   : > { %p1886_p0 = pneg %p1885_p13 }
  0xa8   : > { %p1892_p7 = por %p1891_p5, %p1890_p2 }
  0xaa   : > { %p1893_p9 = pnand %p1892_p7, %p1886_p0 }
  0xac   : > { %1896 = shalt.err (!%p1893_p9)
}
  0xad   : > { %s1897_s23 = scalar_lea.vmem %s2276_s28, 128  ;;  %s2000_s10 = smov [#allocation4]  }
  0xae   : > { %p1898_p4 = scmp.ne.s32.totalorder %s2276_s28, %s1897_s23  ;;  %s1902_s15 = sshll.u32 %s2000_s10, 4  ;;  %s1903_s15 = int_to_ptr.vmem [resolvable:$false] %s1902_s15 }
  0xaf   : > { %s1904_s16 = scalar_lea.vmem %s1903_s15, 256  ;;  %p1905_p10 = scmp.lt.s32.totalorder %s2276_s28, %s1903_s15 }
  0xb0   : > { %p1900_p13 = pnand %p1898_p4, %p1884_p8  ;;  %p1906_p1 = scmp.lt.s32.totalorder %s1904_s16, %s1897_s23 }
  0xb2   : > { %p1901_p11 = pneg %p1900_p13  ;;  %p1907_p3 = por %p1906_p1, %p1905_p10 }
  0xb4   : > { %p1908_p2 = pnand %p1907_p3, %p1901_p11 }
  0xb6   : > { %1911 = shalt.err (!%p1908_p2)
}
  0xb7   : > { %1618 = dma.hbm_to_vmem [thread:$0]  (!%p2280_p12), %s2274_s18, 128, %s2276_s28, %s293_s20  }
  0xb8   : > { %p2499_p0 = scmp.ne.s32.totalorder %s2490_s8, 0 }
  0xb9   : > { %s2312_s13 = sand.u32 (!%p2499_p0), 1, %s1982_s25  }
  0xba   : > { %312 = sbr.rel (%p2499_p0) target bundleno = 2506 (0x9ca), region = 48  ;;  %s1438_s17 = sshll.u32 (!%p2499_p0), %s2312_s13, 3 }
  0xbb   : > { %s315_s29 = scalar_lea.sflag (!%p2499_p0), [#allocation5], %s2312_s13  ;;  %s318_s12 = scalar_lea.vmem (!%p2499_p0), [#allocation4], %s1438_s17 }
  0xc1   : > { %1957 = dma.done.wait (%p2255_p6), %s315_s29, 128  }
  0xc2   : > { %1959 = vsyncadd (%p2255_p6), %s315_s29, 4294967168  ;;  %p2500_p10 = scmp.eq.s32.totalorder %s2080_s30, 0 }
  0xc4   : > { %1961 = dma.done.wait (%p2500_p10), [#allocation8], 32   ;;  %p2501_p11 = pmov %p2500_p10 }
  0xc5   : > { %p2502_p12 = pmov %p2500_p10 }
  0xc6   : > { %1963 = vsyncadd (%p2501_p11), [#allocation8], 4294967264 }
  0xc7   : > { %1965 = dma.done.wait (%p2502_p12), [#allocation11], 528   ;;  %p2503_p8 = pmov %p2500_p10 }
  0xc9   : > { %1967 = vsyncadd (%p2503_p8), [#allocation11], 4294966768  ;;  %p2504_p5 = pmov %p2503_p8 }
  0xcb   : > { %1969 = dma.done.wait (%p2504_p5), [#allocation14], 528   ;;  %p2505_p7 = pmov %p2504_p5 }
  0xcc   : > { %vm376_vm0 = vcmask 261120   ;;  %v2334_v0 = vld [vmem:[%s318_s12] sm:$0xff]  ;;  %v413_v7 = vld [vmem:[#allocation10] sm:$0xff]  ;;  %v2001_v10 = vmov 0.0|0.0   ;;  %vm2002_vm1 = vmmov 0   ;;  %v2003_v13 = vmov 0.0  }
  0xcd   : > { %1971 = vsyncadd (%p2505_p7), [#allocation14], 4294966768  ;;  %v377_v1 = vsel %vm376_vm0, %v2334_v0, 0.0  ;;  %v414_v8 = vld [vmem:[#allocation10 + $0x8] sm:$0xff]  ;;  %v415_v9 = vld [vmem:[#allocation10 + $0x10] sm:$0xff]  ;;  %1556 = vmatprep.subr.bf16.mxu0 %v2001_v10  ;;  %1502 = vmatprep.mubr.msk.f32.mxu0 %vm2002_vm1, %v2003_v13  ;;  %vm497_vm4 = vcmask 785408   ;;  %v499_v36 = vlaneseq }
  0xce   : > { %378 = vadd.xlane.f32.xlu0 %v377_v1  ;;  %v1557_v11 = vpack.c.bf16 %v414_v8, %v413_v7  ;;  %v416_v12 = vld [vmem:[#allocation10 + $0x18] sm:$0xff]  ;;  %1505 = vmatprep.subr.mxu1 %v2003_v13  ;;  %v1448_v29 = vld [vmem:[#allocation12] ss:$0 sm:$0xff]  ;;  %s2004_s8 = smov 64   ;;  %s2005_s22 = smov 96   ;;  %vm507_vm5 = vcmask 64512  }
  0xcf   : > { %1507 = vmatprep.mubr.msk.f32.mxu1 %vm2002_vm1, %v2003_v13  ;;  %v1560_v14 = vpack.c.bf16 %v416_v12, %v415_v9  ;;  %v1446_v23 = vld [vmem:[#allocation7] ss:$0 sm:$0xff]  ;;  %v1447_v26 = vld [vmem:[#allocation9] ss:$0 sm:$0xff]  ;;  %s2006_s18 = smov 88   ;;  %s2007_s28 = smov 120  }
  0xd0   : > { %1558 = vmatpush3.bf16.msra.mxu0 %v1557_v11  ;;  %v2364_v37 = vshrl.u32 %v499_v36, 7  ;;  %v2366_v38 = vand.u32 127, %v499_v36  ;;  %s2008_s19 = smov 80   ;;  %s2009_s20 = smov 112   ;;  %vm846_vm7 = vcmask 130112   ;;  %vm1021_vm8 = vcmask 195712  }
  0xd1   : > { %1559 = vmatprep.subr.bf16.mxu0 %v2001_v10  ;;  %s2010_s23 = smov 72   ;;  %s2011_s10 = smov 104   ;;  %vm1196_vm9 = vcmask 261312  }
  0xd2   : > { %vm583_vm6 = vcmp.gt.s32.totalorder %v2366_v38, %v2364_v37  ;;  %s2012_s15 = smov 48   ;;  %s2013_s16 = smov 56  }
  0xd3   : > { %s2014_s29 = smov 40   ;;  %s2015_s12 = smov 8  }
  0xd4   : > { %1561 = vmatpush3.bf16.msra.mxu0 %v1560_v14  ;;  %p2506_p9 = scmp.ne.s32.totalorder %s2496_s9, 0 }
  0xd5   : > { %1525 = vmatprep.subr.mxu0 %v2003_v13 }
 0x15b   : > { %v379_v2 = vpop.xlane.xlu0 %378 }
 0x15c   : > { %v381_v3 = vmul.f32 0.03125, %v379_v2 }
 0x15e   : > { %v382_v4 = vsub.f32 %v2334_v0, %v381_v3 }
 0x160   : > { %v383_v5 = vmul.f32 %v382_v4, %v382_v4  ;;  %v402_v24 = vmul.f32 %v1446_v23, %v382_v4 }
 0x162   : > { %v384_v6 = vsel %vm376_vm0, %v383_v5, 0.0 }
 0x163   : > { %385 = vadd.xlane.f32.xlu0 %v384_v6 }
 0x1f0   : > { %v386_v15 = vpop.xlane.xlu0 %385 }
 0x1f1   : > { %v388_v16 = vmul.f32 0.032258064, %v386_v15 }
 0x1f3   : > { %1694 = vrsqrt.f32 %v388_v16  ;;  %vm391_vm2 = vcmp.eq.f32.partialorder %v388_v16, inf  ;;  %v394_v19 = vand.u32 2147483648, %v388_v16  ;;  %vm393_vm3 = vcmp.eq.f32.partialorder %v388_v16, 0.0 }
 0x1fd   : > { %v1695_v17 = vpop.eup %1694 }
 0x1fe   : > { %v390_v18 = vmul.f32 %v1695_v17, %v388_v16 }
 0x200   : > { %v392_v20 = vsel %vm391_vm2, %v388_v16, %v390_v18 }
 0x201   : > { %v395_v21 = vsel %vm393_vm3, %v394_v19, %v392_v20 }
 0x202   : > { %v403_v22 = vadd.f32 1e-06, %v395_v21 }
 0x204   : > { %1696 = vrcp.f32 %v403_v22 }
 0x20e   : > { %v1697_v25 = vpop.eup %1696 }
 0x20f   : > { %v405_v27 = vmul.f32 %v1697_v25, %v402_v24 }
 0x211   : > { %v412_v28 = vadd.f32 %v1447_v26, %v405_v27 }
 0x213   : > { %1503 = vmatmul.mubr.msk.f32.vlgmr.msra.gmra.mrb[0].mxu0 %vm376_vm0, %v412_v28 }
 0x214   : > { %1527 = vmatprep.mubr.msk.f32.mxu0 %vm2002_vm1, %v2003_v13 }
 0x2e6   : > { %v493_v30 = vpop.f32.mrb[0].mxu0 }
 0x2e7   : > { %v494_v31 = vadd.f32 %v1448_v29, %v493_v30  ;;  %v1504_v32 = vpop.f32.mrb[1].mxu0 }
 0x2e9   : > { %498 = vst.msk [vmem:[#allocation2] sm:$0xff] %vm497_vm4, %v494_v31 }
 0x2f0   : > { %v2351_v33 = vld [vmem:[#allocation2] sm:$0xff] }
 0x2f1   : > { %596 = vrot.lane.b32.xlu0 %v2351_v33, %s2004_s8  ;;  %505 = vrot.lane.b32.xlu1 %v2351_v33, %s2005_s22  ;;  %s2016_s8 = smov 16   ;;  %s2017_s22 = smov 24  }
 0x2f5   : > { %677 = vrot.lane.b32.xlu0 %v2351_v33, %s2006_s18  ;;  %s1465_s18 = sshll.u32 %s2080_s30, 7  ;;  %s1286_s30 = scalar_lea.sflag [#allocation6], %s2312_s13 }
 0x2f9   : > { %675 = vrot.lane.b32.xlu0 %v2351_v33, %s2007_s28  ;;  %s372_s28 = scalar_lea.vmem [#allocation16], %s1438_s17  ;;  %s2018_s17 = smov [#allocation16]  }
 0x363   : > { %v506_v34 = vpop.permute.xlu1 %505  ;;  %v597_v35 = vpop.permute.xlu0 %596 }
 0x364   : > { %1506 = vmatpush3.xpose.msk.msra.mxu1 %vm507_vm5, %v506_v34 }
 0x365   : > { %1510 = vmatprep.subr.mxu1 %v2003_v13 }
 0x367   : > { %1508 = vmatmul.mubr.msk.f32.vlgmr.msra.gmra.mrb[0].mxu1 %vm507_vm5, %v2351_v33  ;;  %v678_v50 = vpop.permute.xlu0 %677 }
 0x368   : > { %1511 = vmatpush3.msra.mxu1 %v597_v35  ;;  %1512 = vmatprep.mubr.msk.f32.mxu1 %vm2002_vm1, %v2003_v13 }
 0x369   : > { %1515 = vmatprep.subr.mxu1 %v2003_v13 }
 0x36b   : > { %v676_v51 = vpop.permute.xlu0 %675 }
 0x43a   : > { %v578_v39 = vpop.f32.mrb[0].mxu1 }
 0x43b   : > { %v582_v40 = vmul.f32 0.35355338, %v578_v39  ;;  %v1509_v41 = vpop.f32.mrb[1].mxu1 }
 0x43c   : > { %v1199_v41 = vld [vmem:[#allocation13] sm:$0xff] }
 0x43d   : > { %v584_v42 = vsel %vm583_vm6, -10000.0, %v582_v40 }
 0x43e   : > { %v585_v43 = vsel %vm507_vm5, %v584_v42, -inf }
 0x43f   : > { %586 = vmax.xlane.f32.xlu1 %v585_v43 }
 0x450   : > { %852 = vrot.lane.b32.xlu1 %v2351_v33, %s2008_s19  ;;  %s1299_s19 = sshll.u32 %s372_s28, 4  ;;  %s2436_s19 = int_to_ptr.vmem [resolvable:$true] %s1299_s19 }
 0x4cc   : > { %v587_v44 = vpop.xlane.xlu1 %586 }
 0x4cd   : > { %v588_v45 = vsub.f32 %v584_v42, %v587_v44  ;;  %v1200_v42 = vld [vmem:[#allocation13 + $0x8] sm:$0xff]  ;;  %v1201_v44 = vld [vmem:[#allocation13 + $0x10] sm:$0xff] }
 0x4ce   : > { %v1563_v43 = vpack.c.bf16 %v1200_v42, %v1199_v41 }
 0x4cf   : > { %v589_v46 = vmul.f32 1.442695, %v588_v45  ;;  %v1202_v45 = vld [vmem:[#allocation13 + $0x18] sm:$0xff] }
 0x4d0   : > { %v853_v47 = vpop.permute.xlu1 %852 }
 0x4d1   : > { %1698 = vpow2.f32 %v589_v46  ;;  %1526 = vmatpush3.xpose.msk.msra.mxu0 %vm507_vm5, %v853_v47  ;;  %v1566_v46 = vpack.c.bf16 %v1202_v45, %v1201_v44 }
 0x4d2   : > { %1535 = vmatprep.subr.mxu0 %v2003_v13 }
 0x4db   : > { %v1699_v48 = vpop.eup %1698 }
 0x4dc   : > { %v591_v49 = vsel %vm507_vm5, %v1699_v48, 0.0 }
 0x4dd   : > { %592 = vadd.xlane.f32.xlu0 %v591_v49 }
 0x4f3   : > { %850 = vrot.lane.b32.xlu0 %v2351_v33, %s2009_s20 }
 0x4f7   : > { %1027 = vrot.lane.b32.xlu0 %v2351_v33, %s2010_s23 }
 0x4fb   : > { %1025 = vrot.lane.b32.xlu0 %v2351_v33, %s2011_s10  ;;  %s2434_s10 = scalar_lea.hbm %s2486_s7, %s1465_s18 }
 0x56a   : > { %v593_v52 = vpop.xlane.xlu0 %592 }
 0x56b   : > { %1700 = vrcp.f32 %v593_v52 }
 0x56e   : > { %v851_v53 = vpop.permute.xlu0 %850 }
 0x56f   : > { %1528 = vmatmul.mubr.msk.f32.vlgmr.msra.gmra.mrb[2].mxu0 %vm507_vm5, %v851_v53 }
 0x570   : > { %1537 = vmatprep.mubr.msk.f32.mxu0 %vm2002_vm1, %v2003_v13 }
 0x572   : > { %v1028_v54 = vpop.permute.xlu0 %1027 }
 0x573   : > { %1536 = vmatpush3.xpose.msk.msra.mxu0 %vm507_vm5, %v1028_v54 }
 0x574   : > { %1562 = vmatprep.subr.bf16.mxu0 %v2001_v10 }
 0x575   : > { %v1701_v55 = vpop.eup %1700 }
 0x576   : > { %v595_v56 = vmul.f32 %v1701_v55, %v1699_v48  ;;  %v1026_v57 = vpop.permute.xlu0 %1025  ;;  %v1462_v55 = vld [vmem:[#allocation15] ss:$0 sm:$0xff] }
 0x577   : > { %1538 = vmatmul.mubr.msk.f32.vlgmr.msra.gmra.mrb[4].mxu0 %vm507_vm5, %v1026_v57 }
 0x578   : > { %1513 = vmatmul.mubr.msk.f32.vlgmr.msra.gmra.mrb[2].mxu1 %vm507_vm5, %v595_v56  ;;  %1553 = vmatprep.mubr.msk.f32.mxu0 %vm2002_vm1, %v2003_v13 }
 0x579   : > { %1516 = vmatpush3.xpose.msk.msra.mxu1 %vm507_vm5, %v678_v50  ;;  %1517 = vmatprep.mubr.msk.f32.mxu1 %vm2002_vm1, %v2003_v13 }
 0x57a   : > { %1520 = vmatprep.subr.mxu1 %v2003_v13  ;;  %1564 = vmatpush3.bf16.msra.mxu0 %v1563_v43 }
 0x57b   : > { %1565 = vmatprep.subr.bf16.mxu0 %v2001_v10 }
 0x57c   : > { %1518 = vmatmul.mubr.msk.f32.vlgmr.msra.gmra.mrb[4].mxu1 %vm507_vm5, %v676_v51 }
 0x57d   : > { %1522 = vmatprep.mubr.msk.f32.mxu1 %vm2002_vm1, %v2003_v13 }
 0x57e   : > { %1567 = vmatpush3.bf16.msra.mxu0 %v1566_v46 }
 0x642   : > { %v924_v58 = vpop.f32.mrb[2].mxu0 }
 0x643   : > { %v928_v59 = vmul.f32 0.35355338, %v924_v58  ;;  %v1529_v60 = vpop.f32.mrb[3].mxu0 }
 0x645   : > { %v929_v61 = vsel %vm583_vm6, -10000.0, %v928_v59 }
 0x646   : > { %v930_v62 = vsel %vm507_vm5, %v929_v61, -inf }
 0x647   : > { %931 = vmax.xlane.f32.xlu1 %v930_v62 }
 0x64a   : > { %v1099_v63 = vpop.f32.mrb[4].mxu0 }
 0x64b   : > { %v668_v1 = vpop.f32.mrb[2].mxu1  ;;  %v1539_v2 = vpop.f32.mrb[5].mxu0  ;;  %v1103_v5 = vmul.f32 0.35355338, %v1099_v63 }
 0x64c   : > { %672 = vst.msk [vmem:[#allocation3] sm:$0xff] %vm507_vm5, %v668_v1  ;;  %v1514_v3 = vpop.f32.mrb[3].mxu1 }
 0x64d   : > { %v1104_v11 = vsel %vm583_vm6, -10000.0, %v1103_v5 }
 0x64e   : > { %v1105_v12 = vsel %vm507_vm5, %v1104_v11, -inf }
 0x64f   : > { %v749_v4 = vpop.f32.mrb[4].mxu1 }
 0x650   : > { %v753_v6 = vmul.f32 0.35355338, %v749_v4  ;;  %v1519_v7 = vpop.f32.mrb[5].mxu1 }
 0x652   : > { %v754_v8 = vsel %vm583_vm6, -10000.0, %v753_v6 }
 0x653   : > { %v755_v9 = vsel %vm507_vm5, %v754_v8, -inf }
 0x654   : > { %756 = vmax.xlane.f32.xlu0 %v755_v9 }
 0x658   : > { %1106 = vmax.xlane.f32.xlu0 %v1105_v12 }
 0x6d4   : > { %v932_v14 = vpop.xlane.xlu1 %931 }
 0x6d5   : > { %v933_v15 = vsub.f32 %v929_v61, %v932_v14 }
 0x6d7   : > { %v934_v16 = vmul.f32 1.442695, %v933_v15 }
 0x6d9   : > { %1702 = vpow2.f32 %v934_v16 }
 0x6e1   : > { %v757_v17 = vpop.xlane.xlu0 %756 }
 0x6e2   : > { %v758_v18 = vsub.f32 %v754_v8, %v757_v17 }
 0x6e3   : > { %v1703_v19 = vpop.eup %1702 }
 0x6e4   : > { %v759_v20 = vmul.f32 1.442695, %v758_v18  ;;  %v936_v21 = vsel %vm507_vm5, %v1703_v19, 0.0 }
 0x6e5   : > { %937 = vadd.xlane.f32.xlu0 %v936_v21  ;;  %v1107_v22 = vpop.xlane.xlu0 %1106 }
 0x6e6   : > { %1704 = vpow2.f32 %v759_v20  ;;  %v1108_v23 = vsub.f32 %v1104_v11, %v1107_v22 }
 0x6e8   : > { %v1109_v24 = vmul.f32 1.442695, %v1108_v23 }
 0x6ea   : > { %1706 = vpow2.f32 %v1109_v24 }
 0x6f0   : > { %v1705_v25 = vpop.eup %1704 }
 0x6f1   : > { %v761_v26 = vsel %vm507_vm5, %v1705_v25, 0.0 }
 0x6f2   : > { %762 = vadd.xlane.f32.xlu0 %v761_v26 }
 0x6f4   : > { %v1707_v27 = vpop.eup %1706 }
 0x6f5   : > { %v1111_v28 = vsel %vm507_vm5, %v1707_v27, 0.0 }
 0x6f6   : > { %1112 = vadd.xlane.f32.xlu1 %v1111_v28 }
 0x707   : > { %941 = vrot.lane.b32.xlu1 %v2351_v33, %s2012_s15  ;;  %s1912_s15 = scalar_lea.vmem %s2436_s19, 128 }
 0x708   : > { %766 = vrot.lane.b32.xlu0 %v2351_v33, %s2013_s16  ;;  %p1913_p6 = scmp.ne.s32.totalorder %s2436_s19, %s1912_s15  ;;  %s1916_s16 = sshll.u32 %s2018_s17, 4  ;;  %s1917_s16 = int_to_ptr.vmem [resolvable:$false] %s1916_s16 }
 0x709   : > { %p1919_p1 = scmp.lt.s32.totalorder %s2436_s19, %s1917_s16 }
 0x70a   : > { %p1914_p4 = pnand %p1913_p6, %p2506_p9 }
 0x70b   : > { %1116 = vrot.lane.b32.xlu1 %v2351_v33, %s2014_s29  ;;  %s1918_s29 = scalar_lea.vmem %s1917_s16, 256 }
 0x70c   : > { %p1915_p13 = pneg %p1914_p4  ;;  %p1920_p3 = scmp.lt.s32.totalorder %s1918_s29, %s1912_s15 }
 0x70e   : > { %p1921_p2 = por %p1920_p3, %p1919_p1 }
 0x710   : > { %p1922_p0 = pnand %p1921_p2, %p1915_p13 }
 0x772   : > { %v938_v29 = vpop.xlane.xlu0 %937 }
 0x77f   : > { %v763_v30 = vpop.xlane.xlu0 %762 }
 0x780   : > { %1708 = vrcp.f32 %v763_v30 }
 0x781   : > { %1710 = vrcp.f32 %v938_v29 }
 0x783   : > { %v1113_v31 = vpop.xlane.xlu1 %1112  ;;  %v767_v32 = vpop.permute.xlu0 %766 }
 0x784   : > { %1521 = vmatpush3.msra.mxu1 %v767_v32  ;;  %1712 = vrcp.f32 %v1113_v31 }
 0x785   : > { %1530 = vmatprep.subr.mxu1 %v2003_v13 }
 0x787   : > { %v942_v36 = vpop.permute.xlu1 %941 }
 0x78a   : > { %v1709_v34 = vpop.eup %1708 }
 0x78b   : > { %v765_v35 = vmul.f32 %v1709_v34, %v1705_v25  ;;  %v1711_v37 = vpop.eup %1710  ;;  %v1117_v39 = vpop.permute.xlu1 %1116 }
 0x78c   : > { %v940_v33 = vmul.f32 %v1711_v37, %v1703_v19 }
 0x78d   : > { %1523 = vmatmul.mubr.msk.f32.vlgmr.msra.gmra.mrb[6].mxu1 %vm507_vm5, %v765_v35 }
 0x78e   : > { %1531 = vmatpush3.msra.mxu1 %v942_v36  ;;  %1532 = vmatprep.mubr.msk.f32.mxu1 %vm2002_vm1, %v2003_v13  ;;  %v1713_v38 = vpop.eup %1712 }
 0x78f   : > { %1540 = vmatprep.subr.mxu1 %v2003_v13  ;;  %v1115_v40 = vmul.f32 %v1713_v38, %v1707_v27 }
 0x791   : > { %1533 = vmatmul.mubr.msk.f32.vlgmr.msra.gmra.mrb[8].mxu1 %vm507_vm5, %v940_v33 }
 0x792   : > { %1541 = vmatpush3.msra.mxu1 %v1117_v39  ;;  %1542 = vmatprep.mubr.msk.f32.mxu1 %vm2002_vm1, %v2003_v13 }
 0x795   : > { %1543 = vmatmul.mubr.msk.f32.vlgmr.msra.gmra.mrb[10].mxu1 %vm507_vm5, %v1115_v40 }
 0x860   : > { %v838_v47 = vpop.f32.mrb[6].mxu1 }
 0x861   : > { %843 = vrot.lane.b32.xlu1 %v838_v47, %s2015_s12  ;;  %v1524_v48 = vpop.f32.mrb[7].mxu1 }
 0x864   : > { %v1013_v49 = vpop.f32.mrb[8].mxu1 }
 0x865   : > { %1018 = vrot.lane.b32.xlu0 %v1013_v49, %s2016_s8  ;;  %v1534_v13 = vpop.f32.mrb[9].mxu1 }
 0x868   : > { %v1188_v50 = vpop.f32.mrb[10].mxu1 }
 0x869   : > { %1193 = vrot.lane.b32.xlu1 %v1188_v50, %s2017_s22  ;;  %v1544_v51 = vpop.f32.mrb[11].mxu1 }
 0x8d3   : > { %v844_v52 = vpop.permute.xlu1 %843 }
 0x8d4   : > { %847 = vst.msk [vmem:[#allocation3] sm:$0xff] %vm846_vm7, %v844_v52 }
 0x8d7   : > { %v1019_v10 = vpop.permute.xlu0 %1018 }
 0x8d8   : > { %1022 = vst.msk [vmem:[#allocation3] sm:$0xff] %vm1021_vm8, %v1019_v10 }
 0x8db   : > { %v1194_v53 = vpop.permute.xlu1 %1193 }
 0x8dc   : > { %1197 = vst.msk [vmem:[#allocation3] sm:$0xff] %vm1196_vm9, %v1194_v53 }
 0x8e3   : > { %v1198_v54 = vld [vmem:[#allocation3] sm:$0xff] }
 0x8e4   : > { %1554 = vmatmul.mubr.msk.f32.vlgmr.msra.gmra.mrb[6].mxu0 %vm376_vm0, %v1198_v54 }
 0x9b7   : > { %v1279_v56 = vpop.f32.mrb[6].mxu0 }
 0x9b8   : > { %v1280_v57 = vadd.f32 %v1462_v55, %v1279_v56  ;;  %v1555_v58 = vpop.f32.mrb[7].mxu0 }
 0x9ba   : > { %v1283_v59 = vadd.f32 %v1280_v57, %v2334_v0 }
 0x9bc   : > { %1284 = vst.msk [vmem:[%s372_s28] sm:$0xff] %vm376_vm0, %v1283_v59 }
 0x9bd   : > { %1925 = shalt.err (!%p1922_p0)
}
 0x9be   : > { %s1926_s13 = scalar_lea.hbm %s2434_s10, 128  ;;  %s1930_s22 = scalar_lea.hbm %s2486_s7, 256 }
 0x9bf   : > { %p1927_p10 = scmp.ne.s32.totalorder %s2434_s10, %s1926_s13  ;;  %p1931_p8 = scmp.lt.u32.totalorder %s2434_s10, %s2486_s7 }
 0x9c0   : > { %p1932_p5 = scmp.lt.u32.totalorder %s1930_s22, %s1926_s13  ;;  %p1934_p6 = scmp.lt.u32.totalorder %s1926_s13, %s2434_s10 }
 0x9c1   : > { %p1928_p11 = pnand %p1927_p10, %p2506_p9 }
 0x9c2   : > { %p1933_p7 = por %p1932_p5, %p1931_p8 }
 0x9c3   : > { %p1929_p12 = pneg %p1928_p11 }
 0x9c4   : > { %p1935_p4 = por %p1934_p6, %p1933_p7 }
 0x9c6   : > { %p1936_p13 = pnand %p1935_p4, %p1929_p12 }
 0x9c8   : > { %1939 = shalt.err (!%p1936_p13)
}
 0x9c9   : > { %1594 = dma.vmem_to_hbm [thread:$0]  (%p2506_p9), %s2436_s19, 128, %s2434_s10, %s1286_s30  }
 0x9ca PF: > { %s1311_s20 = sand.u32 1, %s1978_s24   ;;  %p2507_p1 = scmp.ne.s32.totalorder %s2497_s14, 0 }
 0x9cb   : > { %p2508_p3 = scmp.ge.s32.totalorder %s1990_s27, 2  ;;  %s1312_s23 = scalar_lea.sflag [#allocation6], %s1311_s20 }
 0x9cd   : > { %p1620_p2 = pnand %p2508_p3, %p2507_p1 }
 0x9cf   : > { %1973 = dma.done.wait (!%p1620_p2), %s1312_s23, 128  }
 0x9d0   : > { %1975 = vsyncadd (!%p1620_p2), %s1312_s23, 4294967168  ;;  %p23_p0 = scmp.ge.s32.totalorder %s2236_s11, 4   ;;  %s2509_s24 = smov %s1982_s25 }
 0x9d1   : > { %s2510_s25 = smov %s1986_s26  ;;  %s2511_s26 = smov %s2247_s21 }
 0x9d2   : > { %s2512_s27 = smov %s2236_s11  ;;  %25 = sbr.rel (!%p23_p0) target bundleno = 8 (0x8), region = 117 }
 0x9d9   :  { %1317 = vsyncpa [#allocation5], 1 }
 0x9da   :  { %1319 = vsyncpa [#allocation5 + $0x1], 1 }
 0x9db   :  { %1320 = vsyncpa [#allocation8], 1 }
 0x9dc   :  { %1321 = vsyncpa [#allocation11], 1 }
 0x9dd   :  { %1322 = vsyncpa [#allocation14], 1 }
 0x9de   :  { %1323 = vsyncpa [#allocation6], 1 }
 0x9df   :  { %1325 = vsyncpa [#allocation6 + $0x1], 1 }

</bundles_post_ra>
